<compile_context>
chip_gen: v7x
topology: tpu7x:2x2x1
jax: 0.10.0
libtpu: 0.0.40
codegen_flags: <defaults>
</compile_context>

<pallas_src>
import jax
import jax.numpy as jnp
from jax.experimental import pallas as pl
from jax.experimental.pallas import tpu as pltpu


def _conv1x1_pad_add_kernel(x_ref, w_ref, o_ref):
    """Fused Conv1d(k=1, stride=1, padding=1) + other.

    x_ref: (C_in + 1, N * L)   channel-major flattened input with a ones row
                               appended (for the bias/other fold)
    w_ref: (C_out, C_in + 1)   1x1 conv weight with (bias + other) column
    o_ref: (N, C_out, L + 2)   output (padding=1 on both ends of length axis)
    """
    n_batch, c_out, lp = o_ref.shape
    length = lp - 2
    c_in_aug = w_ref.shape[1]

    w_aug = w_ref[...]                                         # (C_out, C_in+1)

    # Single MXU push: (C_out, C_in+1) @ (C_in+1, N*L).  The ones row of x and
    # the bias column of w mean this is already  conv(x) + bias + other.
    y = jnp.dot(w_aug, x_ref[...],
                preferred_element_type=jnp.float32)            # (C_out, N*L)

    # Zero-padding columns of a kernel_size=1 conv contribute only bias+other,
    # which is exactly the last column of the augmented weight.
    edge = w_aug[:, c_in_aug - 1:c_in_aug]                     # (C_out, 1)

    # Assemble the whole padded output and write it with ONE full-block store.
    rows = []
    for n in range(n_batch):                     # tiny, static, fully unrolled
        y_n = y[:, n * length:(n + 1) * length]                # (C_out, L)
        rows.append(jnp.concatenate([edge, y_n, edge], axis=-1))  # (C_out, L+2)
    out = jnp.stack(rows, axis=0)                              # (N, C_out, L+2)
    o_ref[...] = out.astype(o_ref.dtype)


def conv1x1_pad_add(x, w, b, other=1.0):
    """x: (N, C_in, L), w: (C_out, C_in), b: (C_out,), other: python/np scalar.

    Returns Conv1d(k=1, stride=1, padding=1)(x) + other, shape (N, C_out, L+2).
    """
    N, C_in, L = x.shape
    C_out = w.shape[0]
    Lp = L + 2

    x = x.astype(jnp.float32)
    w = w.astype(jnp.float32)
    # Fold the scalar `other` into the bias (8 scalar adds in the wrapper).
    b2 = b.astype(jnp.float32) + jnp.float32(other)            # (C_out,)

    # x: (N, C_in, L) -> (C_in, N*L), plus a ones row so the matmul applies
    # bias+other directly (K: C_in -> C_in+1, still far below MXU width).
    x_flat = jnp.transpose(x, (1, 0, 2)).reshape(C_in, N * L)
    x_aug = jnp.concatenate(
        [x_flat, jnp.ones((1, N * L), jnp.float32)], axis=0)   # (C_in+1, N*L)
    w_aug = jnp.concatenate([w, b2.reshape(C_out, 1)], axis=1)  # (C_out, C_in+1)

    cost = pl.CostEstimate(
        flops=2 * C_out * (C_in + 1) * N * L,
        transcendentals=0,
        bytes_accessed=4 * (x_aug.size + w_aug.size + N * C_out * Lp),
    )

    # Grid-less call: whole problem is a single VMEM-resident block.
    return pl.pallas_call(
        _conv1x1_pad_add_kernel,
        out_shape=jax.ShapeDtypeStruct((N, C_out, Lp), jnp.float32),
        in_specs=[
            pl.BlockSpec(memory_space=pltpu.MemorySpace.VMEM),
            pl.BlockSpec(memory_space=pltpu.MemorySpace.VMEM),
        ],
        out_specs=pl.BlockSpec(memory_space=pltpu.MemorySpace.VMEM),
        cost_estimate=cost,
    )(x_aug, w_aug)


if __name__ == "__main__":
    key = jax.random.PRNGKey(0)
    kx, kw, kb = jax.random.split(key, 3)

    # Shapes from the module spec: x1 = torch.randn(1, 3, 64)
    N, C_in, C_out, L = 1, 3, 8, 64
    x = jax.random.normal(kx, (N, C_in, L), dtype=jnp.float32)
    # Deterministic Conv1d(3, 8, 1) parameters (kernel_size=1 -> weight (8, 3))
    w = jax.random.normal(kw, (C_out, C_in), dtype=jnp.float32) * 0.1
    b = jax.random.normal(kb, (C_out,), dtype=jnp.float32) * 0.1

    out = conv1x1_pad_add(x, w, b, other=1.0)
    out = jax.block_until_ready(out)

    # Reference check in plain JAX (Conv1d k=1, padding=1, then + 1)
    x_pad = jnp.pad(x, ((0, 0), (0, 0), (1, 1)))
    ref = jnp.einsum("oc,ncl->nol", w, x_pad) + b[None, :, None] + 1.0
    assert out.shape == (N, C_out, L + 2)
    assert jnp.allclose(out, ref, atol=1e-5, rtol=1e-5)

    print("KERNEL_OK")
</pallas_src>

<mosaic_0001>
module attributes {stable_mosaic.version = 11 : i64} {
  func.func @_conv1x1_pad_add_kernel(%arg0: memref<4x64xf32, #tpu.memory_space<vmem>>, %arg1: memref<8x4xf32, #tpu.memory_space<vmem>>, %arg2: memref<1x8x66xf32, #tpu.memory_space<vmem>>) attributes {dimension_semantics = [], scalar_prefetch = 0 : i64, scratch_operands = 0 : i64, tpu.core_type = #tpu.core_type<tc>} {
    %c0 = arith.constant 0 : index
    %c0_0 = arith.constant 0 : index
    %0 = vector.load %arg1[%c0, %c0_0] : memref<8x4xf32, #tpu.memory_space<vmem>>, vector<8x4xf32>
    %c0_1 = arith.constant 0 : index
    %c0_2 = arith.constant 0 : index
    %1 = vector.load %arg0[%c0_1, %c0_2] : memref<4x64xf32, #tpu.memory_space<vmem>>, vector<4x64xf32>
    %cst = arith.constant dense<0.000000e+00> : vector<8x64xf32>
    %2 = tpu.matmul %0, %1, %cst {dimension_numbers = #tpu.dot_dimension_numbers<[1], [0], [0], [1], [0, 0, 1, 1], [], []>} : vector<8x4xf32>, vector<4x64xf32>, vector<8x64xf32> -> vector<8x64xf32>
    %3 = vector.extract_strided_slice %0 {offsets = [0, 3], sizes = [8, 1], strides = [1, 1]} : vector<8x4xf32> to vector<8x1xf32>
    %4 = tpu.concatenate %3, %2, %3 in 1 : vector<8x1xf32>, vector<8x64xf32>, vector<8x1xf32> -> vector<8x66xf32>
    %5 = vector.shape_cast %4 : vector<8x66xf32> to vector<1x8x66xf32>
    %c0_3 = arith.constant 0 : index
    %c0_4 = arith.constant 0 : index
    %c0_5 = arith.constant 0 : index
    %6 = vector.load %arg2[%c0_3, %c0_4, %c0_5] : memref<1x8x66xf32, #tpu.memory_space<vmem>>, vector<1x8x66xf32>
    tpu.vector_store %arg2[%c0_3, %c0_4, %c0_5], %5 {strides = array<i32>} : memref<1x8x66xf32, #tpu.memory_space<vmem>>, vector<1x8x66xf32>,
    return
  }
}

</mosaic_0001>

<bundles_post_ra>
// kernel: tpu_custom_call.1
= control target key start
LH: loop header
LB: loop body
LE: loop exit
PB: predicated region body
PF: predicated region fallthrough
CT: control target
= control target key end

     0   :  { %vm18_vm0 = vcmask 1043456   ;;  %v161_v2 = vmov 0.0   ;;  %vm162_vm1 = vmmov 0   ;;  %vm14_vm2 = vcmask 31744   ;;  %s200_s0 = inlined_call_operand.vmem [shape: f32[4,64], index: 0, kind: input, shape index: {}]   ;;  %s201_s1 = inlined_call_operand.vmem [shape: f32[8,4], index: 1, kind: input, shape index: {}]   ;;  %s202_s2 = inlined_call_operand.hbm [shape: f32[1,8,66], index: 2, kind: output, shape index: {}]  }
   0x1   :  { %v13_v0 = vld [vmem:[%s200_s0] sm:$0xf]  ;;  %126 = vmatprep.subr.mxu0 %v161_v2  ;;  %128 = vmatprep.mubr.msk.f32.mxu0 %vm162_vm1, %v161_v2 }
   0x2   :  { %v12_v1 = vld [vmem:[%s201_s1] sm:$0xff] }
   0x3   :  { %7 = vsyncpa [#allocation3], 0  ;;  %127 = vmatpush3.msk.msra.mxu0 %vm18_vm0, %v13_v0  ;;  %s163_s13 = smov 125   ;;  %s164_s14 = smov 62   ;;  %vm102_vm3 = vcmask 7168   ;;  %vm104_vm4 = vcmask 531456  }
   0x4   :  { %92 = vrot.lane.b32.xlu0 %v12_v1, %s163_s13  ;;  %129 = vmatmul.mubr.msk.f32.vlgmr.msra.gmra.mrb[0].mxu0 %vm14_vm2, %v12_v1  ;;  %s165_s15 = smov 1   ;;  %s166_s0 = smov [#allocation2]   ;;  %vm106_vm5 = vcmask 539648  }
   0x5   :  { %99 = vrot.lane.b32.xlu1 %v12_v1, %s164_s14  ;;  %s114_s1 = sshll.u32 %s166_s0, 4  ;;  %s115_s1 = int_to_ptr.vmem [resolvable:$true] %s114_s1 }
   0x6   :  { %s137_s16 = scalar_lea.vmem %s115_s1, 128  ;;  %p142_p1 = scmp.lt.s32.totalorder %s115_s1, %s115_s1 }
   0x7   :  { %p138_p0 = scmp.ne.s32.totalorder %s115_s1, %s137_s16  ;;  %p143_p2 = scmp.lt.s32.totalorder %s137_s16, %s137_s16 }
   0x9   :  { %p144_p3 = por %p143_p2, %p142_p1 }
   0xb   :  { %p145_p4 = pnand %p144_p3, %p138_p0 }
  0x76   :  { %v93_v5 = vpop.permute.xlu0 %92 }
  0x77   :  { %v100_v6 = vpop.permute.xlu1 %99 }
  0xd7   :  { %v88_v3 = vpop.f32.mrb[0].mxu0 }
  0xd8   :  { %96 = vrot.lane.b32.xlu0 %v88_v3, %s165_s15  ;;  %v130_v4 = vpop.f32.mrb[1].mxu0 }
 0x14a   :  { %v97_v7 = vpop.permute.xlu0 %96 }
 0x14b   :  { %v103_v8 = vsel %vm102_vm3, %v93_v5, %v97_v7 }
 0x14c   :  { %v105_v9 = vsel %vm104_vm4, %v103_v8, %v100_v6 }
 0x14d   :  { %107 = vst.msk [vmem:[#allocation2] sm:$0xff] %vm106_vm5, %v105_v9 }
 0x14e   :  { %148 = shalt.err (!%p145_p4)
}
 0x14f   :  { %s149_s19 = scalar_lea.hbm %s202_s2, 128 }
 0x150   :  { %p150_p5 = scmp.ne.s32.totalorder %s202_s2, %s149_s19  ;;  %p153_p6 = scmp.lt.u32.totalorder %s149_s19, %s202_s2 }
 0x152   :  { %p155_p7 = pnand %p153_p6, %p150_p5 }
 0x154   :  { %158 = shalt.err (!%p155_p7)
}
 0x155   :  { %117 = dma.vmem_to_hbm [thread:$0]  %s115_s1, 128, %s202_s2, [#allocation3]  }
 0x156   :  { %159 = dma.done.wait [#allocation3], 128  }
 0x157   :  { %160 = vsyncadd [#allocation3], 4294967168 }
 0x158   :  { %121 = vsyncpa [#allocation3], 1 }

</bundles_post_ra>
